<compile_context>
chip_gen: v5e
topology: v5e:2x2
jax: 0.10.0
libtpu: 0.0.40
codegen_flags: <defaults>
</compile_context>

<pallas_src>
import jax
import jax.numpy as jnp
from jax.experimental import pallas as pl
from jax.experimental.pallas import tpu as pltpu

INPUT_DIM = 13
HIDDEN_DIM = 64
OUTPUT_DIM = 2
BN_EPS = 1e-5
TM_MAX = 2048  # batch tile (rows per grid step); multiple of 8


def petgnn_kernel(
    x_ref,
    w1_ref, b1_ref,
    w2_ref, b2_ref,   # BN1 folded in
    w3_ref, b3_ref,   # BN2 folded in
    w4_ref, b4_ref,
    out_ref,
):
    # x tile is bf16; all matmuls accumulate in f32 on the MXU.
    x = x_ref[...]

    # Layer 0: Linear(input_dim -> hidden) + ReLU (dropout = identity in eval)
    h = jnp.dot(x, w1_ref[...], preferred_element_type=jnp.float32) + b1_ref[...]
    h = jnp.maximum(h, 0.0)

    # Block 1: Linear + folded BatchNorm (eval stats) + ReLU
    h = jnp.dot(h.astype(jnp.bfloat16), w2_ref[...],
                preferred_element_type=jnp.float32) + b2_ref[...]
    h = jnp.maximum(h, 0.0)

    # Block 2: Linear + folded BatchNorm (eval stats) + ReLU
    h = jnp.dot(h.astype(jnp.bfloat16), w3_ref[...],
                preferred_element_type=jnp.float32) + b3_ref[...]
    h = jnp.maximum(h, 0.0)

    # Output head: Linear(hidden -> output_dim)
    # Output last-dim is 2 (<128 lanes) -> masked stores, but writeback bytes are tiny.
    out = jnp.dot(h.astype(jnp.bfloat16), w4_ref[...],
                  preferred_element_type=jnp.float32) + b4_ref[...]
    out_ref[...] = out.astype(out_ref.dtype)


def _fold_bn(w, b, gamma, beta, mean, var):
    """Fold eval-mode BatchNorm1d into the preceding Linear: y = (x@w + b') * 1, w' = w*s."""
    s = gamma * jax.lax.rsqrt(var + BN_EPS)          # (1, H)
    w_f = (w * s).astype(jnp.bfloat16)               # scale columns of w
    b_f = (b - mean) * s + beta                      # f32 bias
    return w_f, b_f


def petgnn_forward(x, params, *, tile_m=TM_MAX):
    """x: [batch, INPUT_DIM] float32. params: dict from init_params. Returns f32 logits."""
    batch = x.shape[0]

    # --- fold BN + cast weights (all static, happens once under jit) ---
    w1 = params["w1"].astype(jnp.bfloat16)
    b1 = params["b1"]
    w2f, b2f = _fold_bn(params["w2"], params["b2"], params["g1"], params["be1"],
                        params["m1"], params["v1"])
    w3f, b3f = _fold_bn(params["w3"], params["b3"], params["g2"], params["be2"],
                        params["m2"], params["v2"])
    w4 = params["w4"].astype(jnp.bfloat16)
    b4 = params["b4"]

    # --- batch tiling: TM multiple of 8, padded batch divisible by TM ---
    tm = min(tile_m, max(8, ((batch + 7) // 8) * 8))
    padded = pl.cdiv(batch, tm) * tm
    x_bf = x.astype(jnp.bfloat16)
    if padded != batch:
        x_bf = jnp.pad(x_bf, ((0, padded - batch), (0, 0)))

    weights = (w1, b1, w2f, b2f, w3f, b3f, w4, b4)
    const_map = lambda i: (0, 0)                      # weights resident across grid steps
    weight_specs = [pl.BlockSpec(w.shape, const_map) for w in weights]

    out = pl.pallas_call(
        petgnn_kernel,
        out_shape=jax.ShapeDtypeStruct((padded, OUTPUT_DIM), jnp.float32),
        grid=(padded // tm,),
        in_specs=[pl.BlockSpec((tm, INPUT_DIM), lambda i: (i, 0))] + weight_specs,
        out_specs=pl.BlockSpec((tm, OUTPUT_DIM), lambda i: (i, 0)),
        compiler_params=pltpu.CompilerParams(dimension_semantics=("parallel",)),
    )(x_bf, *weights)

    return out[:batch]


def init_params(key):
    """Deterministic synthetic parameter init (shapes match the PyTorch module)."""
    ks = jax.random.split(key, 8)

    def linear(kw, kb, fan_in, fan_out):
        bound = 1.0 / jnp.sqrt(fan_in)
        w = jax.random.uniform(kw, (fan_in, fan_out), jnp.float32, -bound, bound)
        b = jax.random.uniform(kb, (1, fan_out), jnp.float32, -bound, bound)
        return w, b

    w1, b1 = linear(ks[0], ks[1], INPUT_DIM, HIDDEN_DIM)
    w2, b2 = linear(ks[2], ks[3], HIDDEN_DIM, HIDDEN_DIM)
    w3, b3 = linear(ks[4], ks[5], HIDDEN_DIM, HIDDEN_DIM)
    w4, b4 = linear(ks[6], ks[7], HIDDEN_DIM, OUTPUT_DIM)

    ones = jnp.ones((1, HIDDEN_DIM), jnp.float32)
    zeros = jnp.zeros((1, HIDDEN_DIM), jnp.float32)
    return {
        "w1": w1, "b1": b1,
        "w2": w2, "b2": b2, "g1": ones, "be1": zeros, "m1": zeros, "v1": ones,
        "w3": w3, "b3": b3, "g2": ones, "be2": zeros, "m2": zeros, "v2": ones,
        "w4": w4, "b4": b4,
    }


def petgnn_reference(x, p):
    """Pure-JAX f32 reference for sanity checking the kernel."""
    h = jnp.maximum(x @ p["w1"] + p["b1"], 0.0)
    h = h @ p["w2"] + p["b2"]
    h = (h - p["m1"]) * jax.lax.rsqrt(p["v1"] + BN_EPS) * p["g1"] + p["be1"]
    h = jnp.maximum(h, 0.0)
    h = h @ p["w3"] + p["b3"]
    h = (h - p["m2"]) * jax.lax.rsqrt(p["v2"] + BN_EPS) * p["g2"] + p["be2"]
    h = jnp.maximum(h, 0.0)
    return h @ p["w4"] + p["b4"]


if __name__ == "__main__":
    key = jax.random.PRNGKey(0)
    k_param, k_x = jax.random.split(key)

    batch = 8
    x = jax.random.normal(k_x, (batch, INPUT_DIM), jnp.float32)
    params = init_params(k_param)

    out = petgnn_forward(x, params)
    out = jax.block_until_ready(out)

    ref = petgnn_reference(x, params)
    assert out.shape == (batch, OUTPUT_DIM)
    # bf16 matmul path -> loosened tolerance vs. the f32 reference.
    assert jnp.allclose(out, ref, atol=5e-2, rtol=5e-2), "kernel mismatch vs reference"

    print("KERNEL_OK")
</pallas_src>

<mosaic_0001>
module attributes {stable_mosaic.version = 11 : i64} {
  func.func @petgnn_kernel(%arg0: i32, %arg1: memref<8x13xbf16, #tpu.memory_space<vmem>>, %arg2: memref<13x64xbf16, #tpu.memory_space<vmem>>, %arg3: memref<1x64xf32, #tpu.memory_space<vmem>>, %arg4: memref<64x64xbf16, #tpu.memory_space<vmem>>, %arg5: memref<1x64xf32, #tpu.memory_space<vmem>>, %arg6: memref<64x64xbf16, #tpu.memory_space<vmem>>, %arg7: memref<1x64xf32, #tpu.memory_space<vmem>>, %arg8: memref<64x2xbf16, #tpu.memory_space<vmem>>, %arg9: memref<1x2xf32, #tpu.memory_space<vmem>>, %arg10: memref<8x2xf32, #tpu.memory_space<vmem>>) attributes {dimension_semantics = [#tpu.dimension_semantics<parallel>], iteration_bounds = array<i64: 1>, scalar_prefetch = 0 : i64, scratch_operands = 0 : i64, tpu.core_type = #tpu.core_type<tc>, window_params = [{transform_indices = @transform_0, window_bounds = array<i64: 8, 13>}, {pipeline_mode = #tpu.pipeline_mode<synchronous>, transform_indices = @transform_1, window_bounds = array<i64: 13, 64>}, {pipeline_mode = #tpu.pipeline_mode<synchronous>, transform_indices = @transform_2, window_bounds = array<i64: 1, 64>}, {pipeline_mode = #tpu.pipeline_mode<synchronous>, transform_indices = @transform_3, window_bounds = array<i64: 64, 64>}, {pipeline_mode = #tpu.pipeline_mode<synchronous>, transform_indices = @transform_4, window_bounds = array<i64: 1, 64>}, {pipeline_mode = #tpu.pipeline_mode<synchronous>, transform_indices = @transform_5, window_bounds = array<i64: 64, 64>}, {pipeline_mode = #tpu.pipeline_mode<synchronous>, transform_indices = @transform_6, window_bounds = array<i64: 1, 64>}, {pipeline_mode = #tpu.pipeline_mode<synchronous>, transform_indices = @transform_7, window_bounds = array<i64: 64, 2>}, {pipeline_mode = #tpu.pipeline_mode<synchronous>, transform_indices = @transform_8, window_bounds = array<i64: 1, 2>}, {transform_indices = @transform_9, window_bounds = array<i64: 8, 2>}]} {
    %c0 = arith.constant 0 : index
    %c0_0 = arith.constant 0 : index
    %0 = vector.load %arg1[%c0, %c0_0] : memref<8x13xbf16, #tpu.memory_space<vmem>>, vector<8x13xbf16>
    %c0_1 = arith.constant 0 : index
    %c0_2 = arith.constant 0 : index
    %1 = vector.load %arg2[%c0_1, %c0_2] : memref<13x64xbf16, #tpu.memory_space<vmem>>, vector<13x64xbf16>
    %cst = arith.constant dense<0.000000e+00> : vector<8x64xf32>
    %2 = tpu.matmul %0, %1, %cst {dimension_numbers = #tpu.dot_dimension_numbers<[1], [0], [0], [1], [0, 0, 1, 1], [], []>} : vector<8x13xbf16>, vector<13x64xbf16>, vector<8x64xf32> -> vector<8x64xf32>
    %c0_3 = arith.constant 0 : index
    %c0_4 = arith.constant 0 : index
    %3 = vector.load %arg3[%c0_3, %c0_4] : memref<1x64xf32, #tpu.memory_space<vmem>>, vector<1x64xf32>
    %4 = vector.broadcast %3 : vector<1x64xf32> to vector<8x64xf32>
    %5 = arith.addf %2, %4 : vector<8x64xf32>
    %cst_5 = arith.constant 0.000000e+00 : f32
    %6 = vector.broadcast %cst_5 : f32 to vector<8x64xf32>
    %7 = arith.maximumf %5, %6 : vector<8x64xf32>
    %8 = arith.truncf %7 : vector<8x64xf32> to vector<8x64xbf16>
    %c0_6 = arith.constant 0 : index
    %c0_7 = arith.constant 0 : index
    %9 = vector.load %arg4[%c0_6, %c0_7] : memref<64x64xbf16, #tpu.memory_space<vmem>>, vector<64x64xbf16>
    %cst_8 = arith.constant dense<0.000000e+00> : vector<8x64xf32>
    %10 = tpu.matmul %8, %9, %cst_8 {dimension_numbers = #tpu.dot_dimension_numbers<[1], [0], [0], [1], [0, 0, 1, 1], [], []>} : vector<8x64xbf16>, vector<64x64xbf16>, vector<8x64xf32> -> vector<8x64xf32>
    %c0_9 = arith.constant 0 : index
    %c0_10 = arith.constant 0 : index
    %11 = vector.load %arg5[%c0_9, %c0_10] : memref<1x64xf32, #tpu.memory_space<vmem>>, vector<1x64xf32>
    %12 = vector.broadcast %11 : vector<1x64xf32> to vector<8x64xf32>
    %13 = arith.addf %10, %12 : vector<8x64xf32>
    %cst_11 = arith.constant 0.000000e+00 : f32
    %14 = vector.broadcast %cst_11 : f32 to vector<8x64xf32>
    %15 = arith.maximumf %13, %14 : vector<8x64xf32>
    %16 = arith.truncf %15 : vector<8x64xf32> to vector<8x64xbf16>
    %c0_12 = arith.constant 0 : index
    %c0_13 = arith.constant 0 : index
    %17 = vector.load %arg6[%c0_12, %c0_13] : memref<64x64xbf16, #tpu.memory_space<vmem>>, vector<64x64xbf16>
    %cst_14 = arith.constant dense<0.000000e+00> : vector<8x64xf32>
    %18 = tpu.matmul %16, %17, %cst_14 {dimension_numbers = #tpu.dot_dimension_numbers<[1], [0], [0], [1], [0, 0, 1, 1], [], []>} : vector<8x64xbf16>, vector<64x64xbf16>, vector<8x64xf32> -> vector<8x64xf32>
    %c0_15 = arith.constant 0 : index
    %c0_16 = arith.constant 0 : index
    %19 = vector.load %arg7[%c0_15, %c0_16] : memref<1x64xf32, #tpu.memory_space<vmem>>, vector<1x64xf32>
    %20 = vector.broadcast %19 : vector<1x64xf32> to vector<8x64xf32>
    %21 = arith.addf %18, %20 : vector<8x64xf32>
    %cst_17 = arith.constant 0.000000e+00 : f32
    %22 = vector.broadcast %cst_17 : f32 to vector<8x64xf32>
    %23 = arith.maximumf %21, %22 : vector<8x64xf32>
    %24 = arith.truncf %23 : vector<8x64xf32> to vector<8x64xbf16>
    %c0_18 = arith.constant 0 : index
    %c0_19 = arith.constant 0 : index
    %25 = vector.load %arg8[%c0_18, %c0_19] : memref<64x2xbf16, #tpu.memory_space<vmem>>, vector<64x2xbf16>
    %cst_20 = arith.constant dense<0.000000e+00> : vector<8x2xf32>
    %26 = tpu.matmul %24, %25, %cst_20 {dimension_numbers = #tpu.dot_dimension_numbers<[1], [0], [0], [1], [0, 0, 1, 1], [], []>} : vector<8x64xbf16>, vector<64x2xbf16>, vector<8x2xf32> -> vector<8x2xf32>
    %c0_21 = arith.constant 0 : index
    %c0_22 = arith.constant 0 : index
    %27 = vector.load %arg9[%c0_21, %c0_22] : memref<1x2xf32, #tpu.memory_space<vmem>>, vector<1x2xf32>
    %28 = vector.broadcast %27 : vector<1x2xf32> to vector<8x2xf32>
    %29 = arith.addf %26, %28 : vector<8x2xf32>
    %c0_23 = arith.constant 0 : index
    %c0_24 = arith.constant 0 : index
    %30 = vector.load %arg10[%c0_23, %c0_24] : memref<8x2xf32, #tpu.memory_space<vmem>>, vector<8x2xf32>
    tpu.vector_store %arg10[%c0_23, %c0_24], %29 {strides = array<i32>} : memref<8x2xf32, #tpu.memory_space<vmem>>, vector<8x2xf32>,
    return
  }
  func.func @transform_0(%arg0: i32) -> (i32, i32) {
    %c0_i32 = arith.constant 0 : i32
    %c0_i32_0 = arith.constant 0 : i32
    return %arg0, %c0_i32 : i32, i32
  }
  func.func @transform_1(%arg0: i32) -> (i32, i32) {
    %c0_i32 = arith.constant 0 : i32
    %c0_i32_0 = arith.constant 0 : i32
    %c0_i32_1 = arith.constant 0 : i32
    return %c0_i32, %c0_i32_0 : i32, i32
  }
  func.func @transform_2(%arg0: i32) -> (i32, i32) {
    %c0_i32 = arith.constant 0 : i32
    %c0_i32_0 = arith.constant 0 : i32
    %c0_i32_1 = arith.constant 0 : i32
    return %c0_i32, %c0_i32_0 : i32, i32
  }
  func.func @transform_3(%arg0: i32) -> (i32, i32) {
    %c0_i32 = arith.constant 0 : i32
    %c0_i32_0 = arith.constant 0 : i32
    %c0_i32_1 = arith.constant 0 : i32
    return %c0_i32, %c0_i32_0 : i32, i32
  }
  func.func @transform_4(%arg0: i32) -> (i32, i32) {
    %c0_i32 = arith.constant 0 : i32
    %c0_i32_0 = arith.constant 0 : i32
    %c0_i32_1 = arith.constant 0 : i32
    return %c0_i32, %c0_i32_0 : i32, i32
  }
  func.func @transform_5(%arg0: i32) -> (i32, i32) {
    %c0_i32 = arith.constant 0 : i32
    %c0_i32_0 = arith.constant 0 : i32
    %c0_i32_1 = arith.constant 0 : i32
    return %c0_i32, %c0_i32_0 : i32, i32
  }
  func.func @transform_6(%arg0: i32) -> (i32, i32) {
    %c0_i32 = arith.constant 0 : i32
    %c0_i32_0 = arith.constant 0 : i32
    %c0_i32_1 = arith.constant 0 : i32
    return %c0_i32, %c0_i32_0 : i32, i32
  }
  func.func @transform_7(%arg0: i32) -> (i32, i32) {
    %c0_i32 = arith.constant 0 : i32
    %c0_i32_0 = arith.constant 0 : i32
    %c0_i32_1 = arith.constant 0 : i32
    return %c0_i32, %c0_i32_0 : i32, i32
  }
  func.func @transform_8(%arg0: i32) -> (i32, i32) {
    %c0_i32 = arith.constant 0 : i32
    %c0_i32_0 = arith.constant 0 : i32
    %c0_i32_1 = arith.constant 0 : i32
    return %c0_i32, %c0_i32_0 : i32, i32
  }
  func.func @transform_9(%arg0: i32) -> (i32, i32) {
    %c0_i32 = arith.constant 0 : i32
    %c0_i32_0 = arith.constant 0 : i32
    return %arg0, %c0_i32 : i32, i32
  }
}

</mosaic_0001>

<bundles_post_ra>
// kernel: tpu_custom_call.1
= control target key start
LH: loop header
LB: loop body
LE: loop exit
PB: predicated region body
PF: predicated region fallthrough
CT: control target
= control target key end

     0   :  { %14 = vsyncpa [#allocation3], 0  ;;  %s547_s0 = inlined_call_operand.hbm [shape: bf16[8,13], index: 0, kind: input, shape index: {}]   ;;  %s548_s1 = inlined_call_operand.hbm [shape: bf16[13,64], index: 1, kind: input, shape index: {}]   ;;  %s549_s2 = inlined_call_operand.vmem [shape: f32[1,64], index: 2, kind: input, shape index: {}]   ;;  %s550_s3 = inlined_call_operand.vmem [shape: bf16[64,64], index: 3, kind: input, shape index: {}]   ;;  %s551_s4 = inlined_call_operand.vmem [shape: f32[1,64], index: 4, kind: input, shape index: {}]   ;;  %s552_s5 = inlined_call_operand.hbm [shape: bf16[64,64], index: 5, kind: input, shape index: {}]   ;;  %s553_s6 = inlined_call_operand.vmem [shape: f32[1,64], index: 6, kind: input, shape index: {}]   ;;  %s554_s7 = inlined_call_operand.vmem [shape: bf16[64,2], index: 7, kind: input, shape index: {}]   ;;  %s555_s8 = inlined_call_operand.vmem [shape: f32[1,2], index: 8, kind: input, shape index: {}]   ;;  %s556_s9 = inlined_call_operand.vmem [shape: f32[8,2], index: 9, kind: output, shape index: {}]  }
   0x1   :  { %15 = vsyncpa [#allocation5], 0  ;;  %s31_s11 = sshll.u32 %s548_s1, 4  ;;  %s440_s12 = smov [#allocation4]   ;;  %s32_s11 = int_to_ptr.hbm [resolvable:$true] %s31_s11 }
   0x2   :  { %s33_s13 = sshll.u32 %s440_s12, 4  ;;  %s21_s16 = sshll.u32 %s547_s0, 4  ;;  %s34_s13 = int_to_ptr.vmem [resolvable:$true] %s33_s13  ;;  %s22_s16 = int_to_ptr.hbm [resolvable:$true] %s21_s16 }
   0x3   :  { %s441_s17 = smov 64   ;;  %s442_s18 = smov 4  }
   0x4   :  { %39 = dma.hbm_to_vmem [thread:$0]  %s32_s11, 128, %s34_s13, [#allocation5], %s441_s17, %s441_s17, %s442_s18  }
   0x5   :  { %s443_s19 = smov [#allocation2]   ;;  %s50_s23 = sshll.u32 %s552_s5, 4  ;;  %s51_s23 = int_to_ptr.hbm [resolvable:$true] %s50_s23 }
   0x6   :  { %s23_s20 = sshll.u32 %s443_s19, 4  ;;  %s444_s1 = smov [#allocation6]   ;;  %s24_s20 = int_to_ptr.vmem [resolvable:$true] %s23_s20 }
   0x7   :  { %26 = dma.hbm_to_vmem [thread:$0]  %s22_s16, 64, %s24_s20, [#allocation3]  }
   0x8   :  { %s52_s24 = sshll.u32 %s444_s1, 4  ;;  %s53_s24 = int_to_ptr.vmem [resolvable:$true] %s52_s24 }
   0x9   :  { %58 = dma.hbm_to_vmem [thread:$0]  %s51_s23, 512, %s53_s24, [#allocation5], %s441_s17, %s441_s17, %s442_s18  }
   0xa   :  { %436 = dma.done.wait [#allocation3], 64  }
   0xb   :  { %437 = vsyncadd [#allocation3], 4294967232 }
   0xc   :  { %438 = dma.done.wait [#allocation5], 640  }
   0xd   :  { %439 = vsyncadd [#allocation5], 4294966656  ;;  %vm94_vm0 = vcmask 1045504   ;;  %vm95_vm1 = vcmask 1046528   ;;  %v445_v0 = vmov 65535   ;;  %v345_v6 = vld [vmem:[%s550_s3 + $0x18] sm:$0xff] }
   0xe   :  { %v96_v1 = vsel %vm94_vm0, 4294967295, %v445_v0  ;;  %v287_v2 = vld [vmem:[#allocation4] sm:$0xf]  ;;  %v341_v3 = vld [vmem:[#allocation4] sm:$0x70]  ;;  %160 = vmatpush.bf16.msra.mxu1 %v345_v6  ;;  %v344_v8 = vld [vmem:[%s550_s3 + $0x10] sm:$0xff] }
   0xf   :  { %v97_v4 = vsel %vm95_vm1, %v96_v1, 0  ;;  %v288_v5 = vor.u32 %v341_v3, %v287_v2  ;;  %v78_v9 = vld [vmem:[#allocation2] sm:$0xf]  ;;  %vm90_vm2 = vcmask 105472   ;;  %v343_v10 = vld [vmem:[%s550_s3 + $0x8] sm:$0xff]  ;;  %vm152_vm3 = vcmask 523264  }
  0x10   :  { %v342_v11 = vld [vmem:[%s550_s3] sm:$0xff]  ;;  %v347_v20 = vld [vmem:[#allocation6 + $0x8] sm:$0xff]  ;;  %v346_v21 = vld [vmem:[#allocation6] sm:$0xff]  ;;  %vm277_vm4 = vcmask 15360  }
  0x11   :  { %v99_v7 = vand.u32 %v288_v5, %v97_v4  ;;  %v349_v12 = vld [vmem:[#allocation6 + $0x18] sm:$0xff]  ;;  %v348_v13 = vld [vmem:[#allocation6 + $0x10] sm:$0xff]  ;;  %v352_v23 = vld [vmem:[%s554_s7 + $0x10] sm:$0xff] }
  0x12   :  { %161 = vmatpush.bf16.msra.mxu1 %v344_v8  ;;  %214 = vmatpush.bf16.msra.mxu2 %v349_v12  ;;  %v360_v14 = vld [vmem:[%s549_s2] ss:$0 sm:$0xff]  ;;  %v353_v22 = vld [vmem:[%s554_s7 + $0x18] sm:$0xff]  ;;  %v351_v30 = vld [vmem:[%s554_s7 + $0x8] sm:$0xff] }
  0x13   :  { %108 = vmatpush.bf16.msra.mxu0 %v99_v7  ;;  %268 = vmatpush.bf16.msra.mxu3 %v353_v22  ;;  %v361_v24 = vld [vmem:[%s551_s4] ss:$0 sm:$0xff] }
  0x14   :  { %v350_v31 = vld [vmem:[%s554_s7] sm:$0xff] }
  0x15   :  { %v362_v32 = vld [vmem:[%s553_s6] ss:$0 sm:$0xff] }
  0x16   :  { %289 = vmatmul.msk.bf16.vlgmr.msra.gmra.mxu0 %vm90_vm2, %v78_v9  ;;  %162 = vmatpush.bf16.msra.mxu1 %v343_v10  ;;  %v363_v38 = vld [vmem:[%s555_s8] ss:$0 sm:$0xff] }
  0x17   :  { %215 = vmatpush.bf16.msra.mxu2 %v348_v13  ;;  %269 = vmatpush.bf16.msra.mxu3 %v352_v23 }
  0x1a   :  { %163 = vmatpush.bf16.msra.mxu1 %v342_v11 }
  0x1b   :  { %216 = vmatpush.bf16.msra.mxu2 %v347_v20  ;;  %270 = vmatpush.bf16.msra.mxu3 %v351_v30 }
  0x1f   :  { %217 = vmatpush.bf16.msra.mxu2 %v346_v21  ;;  %271 = vmatpush.bf16.msra.mxu3 %v350_v31 }
  0x93   :  { %v110_v15 = vpop.f32.mrf.mxu0 }
  0x94   :  { %v111_v16 = vadd.f32 %v360_v14, %v110_v15 }
  0x96   :  { %v114_v17 = vmax.f32 %v111_v16, 0.0 }
  0x98   :  { %v115_v18 = vpack.c.bf16 %v114_v17, %v114_v17 }
  0x9a   :  { %306 = vmatmul.msk.bf16.vlgmr.msra.gmra.mxu1 %vm152_vm3, %v115_v18 }
  0x9b   :  { %v112_v19 = vpop.f32.mrf.mxu0 }
 0x117   :  { %v165_v25 = vpop.f32.mrf.mxu1 }
 0x118   :  { %v166_v26 = vadd.f32 %v361_v24, %v165_v25 }
 0x11a   :  { %v169_v27 = vmax.f32 %v166_v26, 0.0 }
 0x11c   :  { %v170_v28 = vpack.c.bf16 %v169_v27, %v169_v27 }
 0x11e   :  { %323 = vmatmul.msk.bf16.vlgmr.msra.gmra.mxu2 %vm152_vm3, %v170_v28 }
 0x11f   :  { %v167_v29 = vpop.f32.mrf.mxu1 }
 0x1a1   :  { %v219_v33 = vpop.f32.mrf.mxu2 }
 0x1a2   :  { %v220_v34 = vadd.f32 %v362_v32, %v219_v33 }
 0x1a4   :  { %v223_v35 = vmax.f32 %v220_v34, 0.0 }
 0x1a6   :  { %v224_v36 = vpack.c.bf16 %v223_v35, %v223_v35 }
 0x1a8   :  { %340 = vmatmul.msk.bf16.vlgmr.msra.gmra.mxu3 %vm152_vm3, %v224_v36 }
 0x1a9   :  { %v221_v37 = vpop.f32.mrf.mxu2 }
 0x22b   :  { %v273_v39 = vpop.f32.mrf.mxu3 }
 0x22c   :  { %v274_v40 = vadd.f32 %v363_v38, %v273_v39 }
 0x22e   :  { %278 = vst.msk [vmem:[%s556_s9] sm:$0xff] %vm277_vm4, %v274_v40 }
 0x233   :  { %v275_v41 = vpop.f32.mrf.mxu3 }
 0x234   :  { %283 = vsyncpa [#allocation3], 1 }
 0x235   :  { %284 = vsyncpa [#allocation5], 1 }

</bundles_post_ra>
